<compile_context>
chip_gen: v7x
topology: tpu7x:2x2x1
jax: 0.10.0
libtpu: 0.0.40
codegen_flags: <defaults>
</compile_context>

<pallas_src>
from typing import NamedTuple

import jax
import jax.numpy as jnp
from jax.experimental import pallas as pl
from jax.experimental.pallas import tpu as pltpu


def _round_up(v, m):
    return (v + m - 1) // m * m


# ----------------------------------------------------------------------------- kernel
def mlp3_kernel(x_ref, w1_ref, b1_ref, w2_ref, b2_ref, w3_ref, b3_ref, o_ref):
    # x arrives as f32; cast the tile to bf16 in-kernel (cheap VPU work, hides
    # under the MXU) instead of a wrapper-side pad+cast HBM pass.
    x = x_ref[...].astype(jnp.bfloat16)

    # layer1: x @ W1 + b1   (bf16 operands, f32 accumulate, f32 bias add)
    h1 = jnp.dot(x, w1_ref[...], preferred_element_type=jnp.float32) + b1_ref[...]
    # layer2: h1 @ W2 + b2
    h2 = jnp.dot(h1.astype(jnp.bfloat16), w2_ref[...],
                 preferred_element_type=jnp.float32) + b2_ref[...]
    # layer3: h2 @ W3 + b3
    out = jnp.dot(h2.astype(jnp.bfloat16), w3_ref[...],
                  preferred_element_type=jnp.float32) + b3_ref[...]

    o_ref[...] = out.astype(o_ref.dtype)


# --------------------------------------------------------------------- one-time prep
class PackedParams(NamedTuple):
    w1: jax.Array  # (in_dim, h1_p)  bf16
    b1: jax.Array  # (1, h1_p)       f32
    w2: jax.Array  # (h1_p, h2_p)    bf16
    b2: jax.Array  # (1, h2_p)       f32
    w3: jax.Array  # (h2_p, out_p)   bf16
    b3: jax.Array  # (1, out_p)      f32
    out_dim: int   # un-padded output feature dim


def prepare_params(w1, b1, w2, b2, w3, b3):
    """Pad feature dims to lane multiples (128) and cast weights to bf16 ONCE.

    Weights are stored (in, out) so the kernel computes x @ W.  Padded columns
    are exact zeros, so the forward result is unchanged.
    """
    in_dim, h1_dim = w1.shape
    h2_dim = w2.shape[1]
    out_dim = w3.shape[1]

    h1_p = _round_up(h1_dim, 128)
    h2_p = _round_up(h2_dim, 128)
    out_p = _round_up(out_dim, 128)

    bf16, f32 = jnp.bfloat16, jnp.float32
    w1_p = jnp.zeros((in_dim, h1_p), bf16).at[:, :h1_dim].set(w1.astype(bf16))
    w2_p = jnp.zeros((h1_p, h2_p), bf16).at[:h1_dim, :h2_dim].set(w2.astype(bf16))
    w3_p = jnp.zeros((h2_p, out_p), bf16).at[:h2_dim, :out_dim].set(w3.astype(bf16))
    b1_p = jnp.zeros((1, h1_p), f32).at[:, :h1_dim].set(b1.reshape(1, -1).astype(f32))
    b2_p = jnp.zeros((1, h2_p), f32).at[:, :h2_dim].set(b2.reshape(1, -1).astype(f32))
    b3_p = jnp.zeros((1, out_p), f32).at[:, :out_dim].set(b3.reshape(1, -1).astype(f32))
    return PackedParams(w1_p, b1_p, w2_p, b2_p, w3_p, b3_p, out_dim)


# -------------------------------------------------------------------------- forward
def mlp3_forward(x, p: PackedParams):
    """x: (batch, in_dim) float32. Params pre-padded/cast by prepare_params."""
    x = x.astype(jnp.float32)
    batch, in_dim = x.shape
    assert p.w1.shape[0] == in_dim, "in_dim mismatch with prepared params"
    h1_p = p.w1.shape[1]
    h2_p = p.w2.shape[1]
    out_p = p.w3.shape[1]

    # Batch tile: multiple of 16 (bf16 sublane packing), capped at 256 so
    # batch >= 512 gives >= 2 "parallel" grid steps (v7x megacore) and the f32
    # intermediates stay register/VMEM friendly.
    tb = min(256, _round_up(batch, 16))
    b_p = _round_up(batch, tb)

    # Pad only the batch rows of x (f32, no cast pass); in_dim stays native.
    if b_p != batch:
        x_in = jnp.zeros((b_p, in_dim), jnp.float32).at[:batch, :].set(x)
    else:
        x_in = x

    grid = (b_p // tb,)

    # -------- VMEM budget (explicit, conservative: assume 2 buffers everywhere) ----
    w_bytes = (in_dim * h1_p + h1_p * h2_p + h2_p * out_p) * 2      # bf16 weights
    bias_bytes = (h1_p + h2_p + out_p) * 4                          # f32 biases
    x_tile_bytes = tb * in_dim * 4
    o_tile_bytes = tb * out_p * 4
    inter_bytes = tb * max(h1_p, h2_p) * 4 * 2                      # f32 intermediates
    needed = 2 * (w_bytes + bias_bytes) + 2 * (x_tile_bytes + o_tile_bytes) + inter_bytes
    vmem_limit = int(min(64 << 20, max(24 << 20, 2 * needed)))

    flops = 2 * b_p * (in_dim * h1_p + h1_p * h2_p + h2_p * out_p)
    bytes_accessed = (b_p * in_dim * 4) + w_bytes + bias_bytes + (b_p * out_p * 4)

    def build(single_buffer_resident: bool):
        if single_buffer_resident:
            # Constant-index blocks never change -> 1 VMEM buffer is enough.
            def resident(shape):
                return pl.BlockSpec(shape, lambda i: (0, 0),
                                    pipeline_mode=pl.Buffered(1))
        else:
            def resident(shape):
                return pl.BlockSpec(shape, lambda i: (0, 0))

        in_specs = [
            pl.BlockSpec((tb, in_dim), lambda i: (i, 0)),   # x: batch-tiled, f32
            resident((in_dim, h1_p)),
            resident((1, h1_p)),
            resident((h1_p, h2_p)),
            resident((1, h2_p)),
            resident((h2_p, out_p)),
            resident((1, out_p)),
        ]
        out_specs = pl.BlockSpec((tb, out_p), lambda i: (i, 0))

        return pl.pallas_call(
            mlp3_kernel,
            out_shape=jax.ShapeDtypeStruct((b_p, out_p), jnp.float32),
            grid=grid,
            in_specs=in_specs,
            out_specs=out_specs,
            compiler_params=pltpu.CompilerParams(
                dimension_semantics=("parallel",),
                vmem_limit_bytes=vmem_limit,
            ),
            cost_estimate=pl.CostEstimate(
                flops=flops, transcendentals=0, bytes_accessed=bytes_accessed
            ),
        )

    args = (x_in, p.w1, p.b1, p.w2, p.b2, p.w3, p.b3)
    try:
        out_padded = build(True)(*args)
    except Exception:
        # Fallback if pipeline_mode=pl.Buffered(1) is unsupported by this Pallas build.
        out_padded = build(False)(*args)

    return out_padded[:batch, :p.out_dim]


# --------------------------------------------------------------------------- init
def init_params(key, in_dim, hidden1, hidden2, out_dim):
    """Deterministic init mimicking nn.Linear's uniform(-1/sqrt(fan_in), 1/sqrt(fan_in))."""
    ks = jax.random.split(key, 6)

    def linear(kw, kb, fan_in, fan_out):
        bound = 1.0 / jnp.sqrt(fan_in)
        # PyTorch stores weight as (out, in); we store transposed (in, out) for x @ W.
        w = jax.random.uniform(kw, (fan_in, fan_out), jnp.float32, -bound, bound)
        b = jax.random.uniform(kb, (1, fan_out), jnp.float32, -bound, bound)
        return w, b

    w1, b1 = linear(ks[0], ks[1], in_dim, hidden1)
    w2, b2 = linear(ks[2], ks[3], hidden1, hidden2)
    w3, b3 = linear(ks[4], ks[5], hidden2, out_dim)
    return w1, b1, w2, b2, w3, b3


if __name__ == "__main__":
    # Small shapes consistent with the 3-layer MLP forward.
    batch, in_dim, hidden1, hidden2, out_dim = 8, 32, 64, 48, 16

    key = jax.random.PRNGKey(0)
    kx, kp = jax.random.split(key)
    x = jax.random.normal(kx, (batch, in_dim), jnp.float32)
    raw_params = init_params(kp, in_dim, hidden1, hidden2, out_dim)

    # One-time (per model) weight padding + bf16 cast, hoisted out of the forward.
    packed = prepare_params(*raw_params)

    out = mlp3_forward(x, packed)
    jax.block_until_ready(out)

    # Cross-check against plain JAX f32 reference of the same forward pass.
    # (Kernel uses bf16 matmul operands with f32 accumulation -> relaxed tolerance.)
    w1, b1, w2, b2, w3, b3 = raw_params
    ref = ((x @ w1 + b1) @ w2 + b2) @ w3 + b3
    assert out.shape == (batch, out_dim)
    assert jnp.allclose(out, ref, atol=5e-2, rtol=5e-2), (
        float(jnp.max(jnp.abs(out - ref)))
    )

    print("KERNEL_OK")
</pallas_src>

<mosaic_0001>
module attributes {stable_mosaic.version = 11 : i64} {
  func.func @mlp3_kernel(%arg0: i32, %arg1: memref<16x32xf32, #tpu.memory_space<vmem>>, %arg2: memref<32x128xbf16, #tpu.memory_space<vmem>>, %arg3: memref<1x128xf32, #tpu.memory_space<vmem>>, %arg4: memref<128x128xbf16, #tpu.memory_space<vmem>>, %arg5: memref<1x128xf32, #tpu.memory_space<vmem>>, %arg6: memref<128x128xbf16, #tpu.memory_space<vmem>>, %arg7: memref<1x128xf32, #tpu.memory_space<vmem>>, %arg8: memref<16x128xf32, #tpu.memory_space<vmem>>) attributes {dimension_semantics = [#tpu.dimension_semantics<parallel>], iteration_bounds = array<i64: 1>, scalar_prefetch = 0 : i64, scratch_operands = 0 : i64, tpu.core_type = #tpu.core_type<tc>, window_params = [{transform_indices = @transform_0, window_bounds = array<i64: 16, 32>}, {pipeline_mode = #tpu.pipeline_mode<synchronous>, transform_indices = @transform_1, window_bounds = array<i64: 32, 128>}, {pipeline_mode = #tpu.pipeline_mode<synchronous>, transform_indices = @transform_2, window_bounds = array<i64: 1, 128>}, {pipeline_mode = #tpu.pipeline_mode<synchronous>, transform_indices = @transform_3, window_bounds = array<i64: 128, 128>}, {pipeline_mode = #tpu.pipeline_mode<synchronous>, transform_indices = @transform_4, window_bounds = array<i64: 1, 128>}, {pipeline_mode = #tpu.pipeline_mode<synchronous>, transform_indices = @transform_5, window_bounds = array<i64: 128, 128>}, {pipeline_mode = #tpu.pipeline_mode<synchronous>, transform_indices = @transform_6, window_bounds = array<i64: 1, 128>}, {transform_indices = @transform_7, window_bounds = array<i64: 16, 128>}]} {
    %c0 = arith.constant 0 : index
    %c0_0 = arith.constant 0 : index
    %0 = vector.load %arg1[%c0, %c0_0] : memref<16x32xf32, #tpu.memory_space<vmem>>, vector<16x32xf32>
    %1 = arith.truncf %0 : vector<16x32xf32> to vector<16x32xbf16>
    %c0_1 = arith.constant 0 : index
    %c0_2 = arith.constant 0 : index
    %2 = vector.load %arg2[%c0_1, %c0_2] : memref<32x128xbf16, #tpu.memory_space<vmem>>, vector<32x128xbf16>
    %cst = arith.constant dense<0.000000e+00> : vector<16x128xf32>
    %3 = tpu.matmul %1, %2, %cst {dimension_numbers = #tpu.dot_dimension_numbers<[1], [0], [0], [1], [0, 0, 1, 1], [], []>} : vector<16x32xbf16>, vector<32x128xbf16>, vector<16x128xf32> -> vector<16x128xf32>
    %c0_3 = arith.constant 0 : index
    %c0_4 = arith.constant 0 : index
    %4 = vector.load %arg3[%c0_3, %c0_4] : memref<1x128xf32, #tpu.memory_space<vmem>>, vector<1x128xf32>
    %5 = vector.broadcast %4 : vector<1x128xf32> to vector<16x128xf32>
    %6 = arith.addf %3, %5 : vector<16x128xf32>
    %7 = arith.truncf %6 : vector<16x128xf32> to vector<16x128xbf16>
    %c0_5 = arith.constant 0 : index
    %c0_6 = arith.constant 0 : index
    %8 = vector.load %arg4[%c0_5, %c0_6] : memref<128x128xbf16, #tpu.memory_space<vmem>>, vector<128x128xbf16>
    %cst_7 = arith.constant dense<0.000000e+00> : vector<16x128xf32>
    %9 = tpu.matmul %7, %8, %cst_7 {dimension_numbers = #tpu.dot_dimension_numbers<[1], [0], [0], [1], [0, 0, 1, 1], [], []>} : vector<16x128xbf16>, vector<128x128xbf16>, vector<16x128xf32> -> vector<16x128xf32>
    %c0_8 = arith.constant 0 : index
    %c0_9 = arith.constant 0 : index
    %10 = vector.load %arg5[%c0_8, %c0_9] : memref<1x128xf32, #tpu.memory_space<vmem>>, vector<1x128xf32>
    %11 = vector.broadcast %10 : vector<1x128xf32> to vector<16x128xf32>
    %12 = arith.addf %9, %11 : vector<16x128xf32>
    %13 = arith.truncf %12 : vector<16x128xf32> to vector<16x128xbf16>
    %c0_10 = arith.constant 0 : index
    %c0_11 = arith.constant 0 : index
    %14 = vector.load %arg6[%c0_10, %c0_11] : memref<128x128xbf16, #tpu.memory_space<vmem>>, vector<128x128xbf16>
    %cst_12 = arith.constant dense<0.000000e+00> : vector<16x128xf32>
    %15 = tpu.matmul %13, %14, %cst_12 {dimension_numbers = #tpu.dot_dimension_numbers<[1], [0], [0], [1], [0, 0, 1, 1], [], []>} : vector<16x128xbf16>, vector<128x128xbf16>, vector<16x128xf32> -> vector<16x128xf32>
    %c0_13 = arith.constant 0 : index
    %c0_14 = arith.constant 0 : index
    %16 = vector.load %arg7[%c0_13, %c0_14] : memref<1x128xf32, #tpu.memory_space<vmem>>, vector<1x128xf32>
    %17 = vector.broadcast %16 : vector<1x128xf32> to vector<16x128xf32>
    %18 = arith.addf %15, %17 : vector<16x128xf32>
    %c0_15 = arith.constant 0 : index
    %c0_16 = arith.constant 0 : index
    %19 = vector.load %arg8[%c0_15, %c0_16] : memref<16x128xf32, #tpu.memory_space<vmem>>, vector<16x128xf32>
    tpu.vector_store %arg8[%c0_15, %c0_16], %18 {strides = array<i32>} : memref<16x128xf32, #tpu.memory_space<vmem>>, vector<16x128xf32>,
    return
  }
  func.func @transform_0(%arg0: i32) -> (i32, i32) {
    %c0_i32 = arith.constant 0 : i32
    %c0_i32_0 = arith.constant 0 : i32
    return %arg0, %c0_i32 : i32, i32
  }
  func.func @transform_1(%arg0: i32) -> (i32, i32) {
    %c0_i32 = arith.constant 0 : i32
    %c0_i32_0 = arith.constant 0 : i32
    %c0_i32_1 = arith.constant 0 : i32
    return %c0_i32, %c0_i32_0 : i32, i32
  }
  func.func @transform_2(%arg0: i32) -> (i32, i32) {
    %c0_i32 = arith.constant 0 : i32
    %c0_i32_0 = arith.constant 0 : i32
    %c0_i32_1 = arith.constant 0 : i32
    return %c0_i32, %c0_i32_0 : i32, i32
  }
  func.func @transform_3(%arg0: i32) -> (i32, i32) {
    %c0_i32 = arith.constant 0 : i32
    %c0_i32_0 = arith.constant 0 : i32
    %c0_i32_1 = arith.constant 0 : i32
    return %c0_i32, %c0_i32_0 : i32, i32
  }
  func.func @transform_4(%arg0: i32) -> (i32, i32) {
    %c0_i32 = arith.constant 0 : i32
    %c0_i32_0 = arith.constant 0 : i32
    %c0_i32_1 = arith.constant 0 : i32
    return %c0_i32, %c0_i32_0 : i32, i32
  }
  func.func @transform_5(%arg0: i32) -> (i32, i32) {
    %c0_i32 = arith.constant 0 : i32
    %c0_i32_0 = arith.constant 0 : i32
    %c0_i32_1 = arith.constant 0 : i32
    return %c0_i32, %c0_i32_0 : i32, i32
  }
  func.func @transform_6(%arg0: i32) -> (i32, i32) {
    %c0_i32 = arith.constant 0 : i32
    %c0_i32_0 = arith.constant 0 : i32
    %c0_i32_1 = arith.constant 0 : i32
    return %c0_i32, %c0_i32_0 : i32, i32
  }
  func.func @transform_7(%arg0: i32) -> (i32, i32) {
    %c0_i32 = arith.constant 0 : i32
    %c0_i32_0 = arith.constant 0 : i32
    return %arg0, %c0_i32 : i32, i32
  }
}

module attributes {stable_mosaic.version = 11 : i64} {
  func.func @mlp3_kernel(%arg0: i32, %arg1: memref<16x32xf32, #tpu.memory_space<vmem>>, %arg2: memref<32x128xbf16, #tpu.memory_space<vmem>>, %arg3: memref<1x128xf32, #tpu.memory_space<vmem>>, %arg4: memref<128x128xbf16, #tpu.memory_space<vmem>>, %arg5: memref<1x128xf32, #tpu.memory_space<vmem>>, %arg6: memref<128x128xbf16, #tpu.memory_space<vmem>>, %arg7: memref<1x128xf32, #tpu.memory_space<vmem>>, %arg8: memref<16x128xf32, #tpu.memory_space<vmem>>) attributes {dimension_semantics = [#tpu.dimension_semantics<parallel>], iteration_bounds = array<i64: 1>, scalar_prefetch = 0 : i64, scratch_operands = 0 : i64, tpu.core_type = #tpu.core_type<tc>, window_params = [{transform_indices = @transform_0, window_bounds = array<i64: 16, 32>}, {pipeline_mode = #tpu.pipeline_mode<synchronous>, transform_indices = @transform_1, window_bounds = array<i64: 32, 128>}, {pipeline_mode = #tpu.pipeline_mode<synchronous>, transform_indices = @transform_2, window_bounds = array<i64: 1, 128>}, {pipeline_mode = #tpu.pipeline_mode<synchronous>, transform_indices = @transform_3, window_bounds = array<i64: 128, 128>}, {pipeline_mode = #tpu.pipeline_mode<synchronous>, transform_indices = @transform_4, window_bounds = array<i64: 1, 128>}, {pipeline_mode = #tpu.pipeline_mode<synchronous>, transform_indices = @transform_5, window_bounds = array<i64: 128, 128>}, {pipeline_mode = #tpu.pipeline_mode<synchronous>, transform_indices = @transform_6, window_bounds = array<i64: 1, 128>}, {transform_indices = @transform_7, window_bounds = array<i64: 16, 128>}]} {
    %c0 = arith.constant 0 : index
    %c0_0 = arith.constant 0 : index
    %0 = vector.load %arg1[%c0, %c0_0] : memref<16x32xf32, #tpu.memory_space<vmem>>, vector<16x32xf32>
    %1 = arith.truncf %0 : vector<16x32xf32> to vector<16x32xbf16>
    %c0_1 = arith.constant 0 : index
    %c0_2 = arith.constant 0 : index
    %2 = vector.load %arg2[%c0_1, %c0_2] : memref<32x128xbf16, #tpu.memory_space<vmem>>, vector<32x128xbf16>
    %cst = arith.constant dense<0.000000e+00> : vector<16x128xf32>
    %3 = tpu.matmul %1, %2, %cst {dimension_numbers = #tpu.dot_dimension_numbers<[1], [0], [0], [1], [0, 0, 1, 1], [], []>} : vector<16x32xbf16>, vector<32x128xbf16>, vector<16x128xf32> -> vector<16x128xf32>
    %c0_3 = arith.constant 0 : index
    %c0_4 = arith.constant 0 : index
    %4 = vector.load %arg3[%c0_3, %c0_4] : memref<1x128xf32, #tpu.memory_space<vmem>>, vector<1x128xf32>
    %5 = vector.broadcast %4 : vector<1x128xf32> to vector<16x128xf32>
    %6 = arith.addf %3, %5 : vector<16x128xf32>
    %7 = arith.truncf %6 : vector<16x128xf32> to vector<16x128xbf16>
    %c0_5 = arith.constant 0 : index
    %c0_6 = arith.constant 0 : index
    %8 = vector.load %arg4[%c0_5, %c0_6] : memref<128x128xbf16, #tpu.memory_space<vmem>>, vector<128x128xbf16>
    %cst_7 = arith.constant dense<0.000000e+00> : vector<16x128xf32>
    %9 = tpu.matmul %7, %8, %cst_7 {dimension_numbers = #tpu.dot_dimension_numbers<[1], [0], [0], [1], [0, 0, 1, 1], [], []>} : vector<16x128xbf16>, vector<128x128xbf16>, vector<16x128xf32> -> vector<16x128xf32>
    %c0_8 = arith.constant 0 : index
    %c0_9 = arith.constant 0 : index
    %10 = vector.load %arg5[%c0_8, %c0_9] : memref<1x128xf32, #tpu.memory_space<vmem>>, vector<1x128xf32>
    %11 = vector.broadcast %10 : vector<1x128xf32> to vector<16x128xf32>
    %12 = arith.addf %9, %11 : vector<16x128xf32>
    %13 = arith.truncf %12 : vector<16x128xf32> to vector<16x128xbf16>
    %c0_10 = arith.constant 0 : index
    %c0_11 = arith.constant 0 : index
    %14 = vector.load %arg6[%c0_10, %c0_11] : memref<128x128xbf16, #tpu.memory_space<vmem>>, vector<128x128xbf16>
    %cst_12 = arith.constant dense<0.000000e+00> : vector<16x128xf32>
    %15 = tpu.matmul %13, %14, %cst_12 {dimension_numbers = #tpu.dot_dimension_numbers<[1], [0], [0], [1], [0, 0, 1, 1], [], []>} : vector<16x128xbf16>, vector<128x128xbf16>, vector<16x128xf32> -> vector<16x128xf32>
    %c0_13 = arith.constant 0 : index
    %c0_14 = arith.constant 0 : index
    %16 = vector.load %arg7[%c0_13, %c0_14] : memref<1x128xf32, #tpu.memory_space<vmem>>, vector<1x128xf32>
    %17 = vector.broadcast %16 : vector<1x128xf32> to vector<16x128xf32>
    %18 = arith.addf %15, %17 : vector<16x128xf32>
    %c0_15 = arith.constant 0 : index
    %c0_16 = arith.constant 0 : index
    %19 = vector.load %arg8[%c0_15, %c0_16] : memref<16x128xf32, #tpu.memory_space<vmem>>, vector<16x128xf32>
    tpu.vector_store %arg8[%c0_15, %c0_16], %18 {strides = array<i32>} : memref<16x128xf32, #tpu.memory_space<vmem>>, vector<16x128xf32>,
    return
  }
  func.func @transform_0(%arg0: i32) -> (i32, i32) {
    %c0_i32 = arith.constant 0 : i32
    %c0_i32_0 = arith.constant 0 : i32
    return %arg0, %c0_i32 : i32, i32
  }
  func.func @transform_1(%arg0: i32) -> (i32, i32) {
    %c0_i32 = arith.constant 0 : i32
    %c0_i32_0 = arith.constant 0 : i32
    %c0_i32_1 = arith.constant 0 : i32
    return %c0_i32, %c0_i32_0 : i32, i32
  }
  func.func @transform_2(%arg0: i32) -> (i32, i32) {
    %c0_i32 = arith.constant 0 : i32
    %c0_i32_0 = arith.constant 0 : i32
    %c0_i32_1 = arith.constant 0 : i32
    return %c0_i32, %c0_i32_0 : i32, i32
  }
  func.func @transform_3(%arg0: i32) -> (i32, i32) {
    %c0_i32 = arith.constant 0 : i32
    %c0_i32_0 = arith.constant 0 : i32
    %c0_i32_1 = arith.constant 0 : i32
    return %c0_i32, %c0_i32_0 : i32, i32
  }
  func.func @transform_4(%arg0: i32) -> (i32, i32) {
    %c0_i32 = arith.constant 0 : i32
    %c0_i32_0 = arith.constant 0 : i32
    %c0_i32_1 = arith.constant 0 : i32
    return %c0_i32, %c0_i32_0 : i32, i32
  }
  func.func @transform_5(%arg0: i32) -> (i32, i32) {
    %c0_i32 = arith.constant 0 : i32
    %c0_i32_0 = arith.constant 0 : i32
    %c0_i32_1 = arith.constant 0 : i32
    return %c0_i32, %c0_i32_0 : i32, i32
  }
  func.func @transform_6(%arg0: i32) -> (i32, i32) {
    %c0_i32 = arith.constant 0 : i32
    %c0_i32_0 = arith.constant 0 : i32
    %c0_i32_1 = arith.constant 0 : i32
    return %c0_i32, %c0_i32_0 : i32, i32
  }
  func.func @transform_7(%arg0: i32) -> (i32, i32) {
    %c0_i32 = arith.constant 0 : i32
    %c0_i32_0 = arith.constant 0 : i32
    return %arg0, %c0_i32 : i32, i32
  }
}

</mosaic_0001>

<bundles_post_ra>
// kernel: tpu_custom_call.1
= control target key start
LH: loop header
LB: loop body
LE: loop exit
PB: predicated region body
PF: predicated region fallthrough
CT: control target
= control target key end

     0   :  { %12 = vsyncpa [#allocation3], 0  ;;  %s805_s0 = inlined_call_operand.hbm [shape: f32[16,32], index: 0, kind: input, shape index: {}]   ;;  %s806_s1 = inlined_call_operand.hbm [shape: bf16[32,128], index: 1, kind: input, shape index: {}]   ;;  %s807_s2 = inlined_call_operand.vmem [shape: f32[1,128], index: 2, kind: input, shape index: {}]   ;;  %s808_s3 = inlined_call_operand.hbm [shape: bf16[128,128], index: 3, kind: input, shape index: {}]   ;;  %s809_s4 = inlined_call_operand.vmem [shape: f32[1,128], index: 4, kind: input, shape index: {}]   ;;  %s810_s5 = inlined_call_operand.hbm [shape: bf16[128,128], index: 5, kind: input, shape index: {}]   ;;  %s811_s6 = inlined_call_operand.vmem [shape: f32[1,128], index: 6, kind: input, shape index: {}]   ;;  %s812_s7 = inlined_call_operand.hbm [shape: f32[16,128], index: 7, kind: output, shape index: {}]  }
   0x1   :  { %13 = vsyncpa [#allocation6], 0 }
   0x2   :  { %14 = vsyncpa [#allocation9], 0 }
   0x3   :  { %15 = vsyncpa [#allocation4], 0  ;;  %s639_s24 = smov [#allocation5]   ;;  %s521_s28 = scalar_lea.hbm %s806_s1, 256 }
   0x4   :  { %s33_s25 = sshll.u32 %s639_s24, 4  ;;  %p522_p0 = scmp.ne.s32.totalorder %s806_s1, %s521_s28  ;;  %s34_s25 = int_to_ptr.vmem [resolvable:$true] %s33_s25 }
   0x5   :  { %p525_p1 = scmp.lt.u32.totalorder %s521_s28, %s806_s1 }
   0x7   :  { %p527_p2 = pnand %p525_p1, %p522_p0 }
   0x9   :  { %530 = shalt.err (!%p527_p2)
}
   0xa   :  { %s531_s10 = scalar_lea.vmem %s34_s25, 256  ;;  %p536_p4 = scmp.lt.s32.totalorder %s34_s25, %s34_s25 }
   0xb   :  { %p532_p3 = scmp.ne.s32.totalorder %s34_s25, %s531_s10  ;;  %p537_p5 = scmp.lt.s32.totalorder %s531_s10, %s531_s10 }
   0xd   :  { %p538_p6 = por %p537_p5, %p536_p4 }
   0xf   :  { %p539_p7 = pnand %p538_p6, %p532_p3 }
  0x11   :  { %542 = shalt.err (!%p539_p7)
}
  0x12   :  { %s640_s11 = smov 64   ;;  %s641_s12 = smov 4  }
  0x13   :  { %39 = dma.hbm_to_vmem [thread:$0]  %s806_s1, 256, %s34_s25, [#allocation6], %s640_s11, %s640_s11, %s641_s12  }
  0x14   :  { %s642_s15 = smov [#allocation2]   ;;  %s543_s19 = scalar_lea.hbm %s805_s0, 256 }
  0x15   :  { %s21_s16 = sshll.u32 %s642_s15, 4  ;;  %p544_p8 = scmp.ne.s32.totalorder %s805_s0, %s543_s19  ;;  %s22_s16 = int_to_ptr.vmem [resolvable:$true] %s21_s16 }
  0x16   :  { %p547_p9 = scmp.lt.u32.totalorder %s543_s19, %s805_s0 }
  0x18   :  { %p549_p10 = pnand %p547_p9, %p544_p8 }
  0x1a   :  { %552 = shalt.err (!%p549_p10)
}
  0x1b   :  { %s553_s24 = scalar_lea.vmem %s22_s16, 256  ;;  %p558_p12 = scmp.lt.s32.totalorder %s22_s16, %s22_s16 }
  0x1c   :  { %p554_p11 = scmp.ne.s32.totalorder %s22_s16, %s553_s24  ;;  %p559_p13 = scmp.lt.s32.totalorder %s553_s24, %s553_s24 }
  0x1e   :  { %p560_p0 = por %p559_p13, %p558_p12 }
  0x20   :  { %p561_p1 = pnand %p560_p0, %p554_p11 }
  0x22   :  { %564 = shalt.err (!%p561_p1)
}
  0x23   :  { %s643_s1 = smov 128   ;;  %s644_s25 = smov 8  }
  0x24   :  { %27 = dma.hbm_to_vmem [thread:$0]  %s805_s0, 256, %s22_s16, [#allocation3], %s643_s1, %s643_s1, %s644_s25  }
  0x25   :  { %s645_s28 = smov [#allocation7]   ;;  %s646_s30 = smov [#allocation8]  }
  0x26   :  { %s47_s29 = sshll.u32 %s645_s28, 4  ;;  %s61_s8 = sshll.u32 %s646_s30, 4  ;;  %s48_s29 = int_to_ptr.vmem [resolvable:$true] %s47_s29  ;;  %s720_s8 = int_to_ptr.vmem [resolvable:$true] %s61_s8 }
  0x27   :  { %s565_s13 = scalar_lea.hbm %s808_s3, 1024 }
  0x28   :  { %p566_p2 = scmp.ne.s32.totalorder %s808_s3, %s565_s13  ;;  %p569_p3 = scmp.lt.u32.totalorder %s565_s13, %s808_s3 }
  0x2a   :  { %p571_p4 = pnand %p569_p3, %p566_p2 }
  0x2c   :  { %574 = shalt.err (!%p571_p4)
}
  0x2d   :  { %s575_s0 = scalar_lea.vmem %s48_s29, 1024  ;;  %p580_p6 = scmp.lt.s32.totalorder %s48_s29, %s48_s29 }
  0x2e   :  { %p576_p5 = scmp.ne.s32.totalorder %s48_s29, %s575_s0  ;;  %p581_p7 = scmp.lt.s32.totalorder %s575_s0, %s575_s0 }
  0x30   :  { %p582_p8 = por %p581_p7, %p580_p6 }
  0x32   :  { %p583_p9 = pnand %p582_p8, %p576_p5 }
  0x34   :  { %586 = shalt.err (!%p583_p9)
}
  0x35   :  { %53 = dma.hbm_to_vmem [thread:$0]  %s808_s3, 1024, %s48_s29, [#allocation6], %s640_s11, %s640_s11, %s641_s12  }
  0x36   :  { %s587_s22 = scalar_lea.hbm %s810_s5, 1024 }
  0x37   :  { %p588_p10 = scmp.ne.s32.totalorder %s810_s5, %s587_s22  ;;  %p591_p11 = scmp.lt.u32.totalorder %s587_s22, %s810_s5 }
  0x39   :  { %p593_p12 = pnand %p591_p11, %p588_p10 }
  0x3b   :  { %596 = shalt.err (!%p593_p12)
}
  0x3c   :  { %s597_s28 = scalar_lea.vmem %s720_s8, 1024  ;;  %p602_p0 = scmp.lt.s32.totalorder %s720_s8, %s720_s8 }
  0x3d   :  { %p598_p13 = scmp.ne.s32.totalorder %s720_s8, %s597_s28  ;;  %p603_p1 = scmp.lt.s32.totalorder %s597_s28, %s597_s28 }
  0x3f   :  { %p604_p2 = por %p603_p1, %p602_p0 }
  0x41   :  { %p605_p3 = pnand %p604_p2, %p598_p13 }
  0x43   :  { %608 = shalt.err (!%p605_p3)
}
  0x44   :  { %67 = dma.hbm_to_vmem [thread:$0]  %s810_s5, 1024, %s720_s8, [#allocation9], %s640_s11, %s640_s11, %s641_s12  }
  0x45   :  { %631 = dma.done.wait [#allocation3], 256  }
  0x46   :  { %632 = vsyncadd [#allocation3], 4294967040 }
  0x47   :  { %633 = dma.done.wait [#allocation6], 1280  }
  0x48   :  { %634 = vsyncadd [#allocation6], 4294966016 }
  0x49   :  { %635 = dma.done.wait [#allocation9], 1024  }
  0x4a   :  { %636 = vsyncadd [#allocation9], 4294966272  ;;  %v647_v0 = vmov 0.0   ;;  %vm648_vm0 = vmmov 0   ;;  %v503_v1 = vld [vmem:[#allocation5] sm:$0xff]   ;;  %v504_v2 = vld [vmem:[#allocation5 + $0x8] sm:$0xff]  }
  0x4b   :  { %444 = vmatprep.subr.bf16.mxu0 %v647_v0  ;;  %448 = vmatprep.mubr.msk.bf16.mxu0 %vm648_vm0, %v647_v0  ;;  %v83_v3 = vld [vmem:[#allocation2] sm:$0xff]  ;;  %v84_v4 = vld [vmem:[#allocation2 + $0x8] sm:$0xff]  ;;  %vm109_vm1 = vcmask 261120   ;;  %v507_v8 = vld [vmem:[#allocation7 + $0x10] sm:$0xff]   ;;  %s649_s9 = smov [#allocation10]  }
  0x4c   :  { %452 = vmatprep.subr.bf16.mxu1 %v647_v0  ;;  %468 = vmatprep.mubr.msk.bf16.mxu1 %vm648_vm0, %v647_v0  ;;  %v505_v5 = vld [vmem:[#allocation7] sm:$0xff]   ;;  %v85_v6 = vpack.c.bf16 %v84_v4, %v83_v3  ;;  %v506_v7 = vld [vmem:[#allocation7 + $0x8] sm:$0xff]   ;;  %v508_v9 = vld [vmem:[#allocation7 + $0x18] sm:$0xff]   ;;  %s387_s10 = sshll.u32 %s649_s9, 4  ;;  %s388_s10 = int_to_ptr.vmem [resolvable:$true] %s387_s10 }
  0x4d   :  { %445 = vmatpush3.bf16.msra.mxu0 %v503_v1  ;;  %453 = vmatpush3.bf16.msra.mxu1 %v505_v5  ;;  %v509_v10 = vld [vmem:[#allocation7 + $0x20] sm:$0xff]   ;;  %v510_v11 = vld [vmem:[#allocation7 + $0x28] sm:$0xff]   ;;  %v511_v12 = vld [vmem:[#allocation7 + $0x30] sm:$0xff]   ;;  %p614_p5 = scmp.lt.s32.totalorder %s388_s10, %s388_s10 }
  0x4e   :  { %446 = vmatprep.subr.bf16.mxu0 %v647_v0  ;;  %454 = vmatprep.subr.bf16.mxu1 %v647_v0  ;;  %v512_v13 = vld [vmem:[#allocation7 + $0x38] sm:$0xff]   ;;  %v513_v14 = vld [vmem:[#allocation8] sm:$0xff]   ;;  %v514_v15 = vld [vmem:[#allocation8 + $0x8] sm:$0xff]  }
  0x4f   :  { %v515_v16 = vld [vmem:[#allocation8 + $0x10] sm:$0xff]   ;;  %v516_v17 = vld [vmem:[#allocation8 + $0x18] sm:$0xff]   ;;  %v517_v18 = vld [vmem:[#allocation8 + $0x20] sm:$0xff]  }
  0x50   :  { %v518_v19 = vld [vmem:[#allocation8 + $0x28] sm:$0xff]   ;;  %v401_v20 = vld [vmem:[%s807_s2] ss:$0 sm:$0xff]  ;;  %v519_v28 = vld [vmem:[#allocation8 + $0x30] sm:$0xff]  }
  0x51   :  { %447 = vmatpush3.bf16.msra.mxu0 %v504_v2  ;;  %455 = vmatpush3.bf16.msra.mxu1 %v506_v7  ;;  %v520_v29 = vld [vmem:[#allocation8 + $0x38] sm:$0xff]   ;;  %v405_v30 = vld [vmem:[%s809_s4] ss:$0 sm:$0xff]  ;;  %s609_s4 = scalar_lea.vmem %s388_s10, 256 }
  0x52   :  { %472 = vmatprep.subr.bf16.mxu0 %v647_v0  ;;  %456 = vmatprep.subr.bf16.mxu1 %v647_v0  ;;  %v414_v38 = vld [vmem:[%s811_s6] ss:$0 sm:$0xff]  ;;  %p610_p4 = scmp.ne.s32.totalorder %s388_s10, %s609_s4  ;;  %p615_p6 = scmp.lt.s32.totalorder %s609_s4, %s609_s4 }
  0x54   :  { %449 = vmatmul.mubr.msk.bf16.vlgmr.msra.gmra.mrb[0].mxu0 %vm109_vm1, %v85_v6  ;;  %p616_p7 = por %p615_p6, %p614_p5 }
  0x55   :  { %488 = vmatprep.mubr.msk.bf16.mxu0 %vm648_vm0, %v647_v0  ;;  %457 = vmatpush3.bf16.msra.mxu1 %v507_v8 }
  0x56   :  { %458 = vmatprep.subr.bf16.mxu1 %v647_v0  ;;  %473 = vmatpush3.bf16.msra.mxu0 %v513_v14  ;;  %p617_p8 = pnand %p616_p7, %p610_p4 }
  0x57   :  { %474 = vmatprep.subr.bf16.mxu0 %v647_v0 }
  0x59   :  { %459 = vmatpush3.bf16.msra.mxu1 %v508_v9 }
  0x5a   :  { %460 = vmatprep.subr.bf16.mxu1 %v647_v0  ;;  %475 = vmatpush3.bf16.msra.mxu0 %v514_v15 }
  0x5b   :  { %476 = vmatprep.subr.bf16.mxu0 %v647_v0 }
  0x5d   :  { %461 = vmatpush3.bf16.msra.mxu1 %v509_v10 }
  0x5e   :  { %462 = vmatprep.subr.bf16.mxu1 %v647_v0  ;;  %477 = vmatpush3.bf16.msra.mxu0 %v515_v16 }
  0x5f   :  { %478 = vmatprep.subr.bf16.mxu0 %v647_v0 }
  0x61   :  { %463 = vmatpush3.bf16.msra.mxu1 %v510_v11 }
  0x62   :  { %464 = vmatprep.subr.bf16.mxu1 %v647_v0  ;;  %479 = vmatpush3.bf16.msra.mxu0 %v516_v17 }
  0x63   :  { %480 = vmatprep.subr.bf16.mxu0 %v647_v0 }
  0x65   :  { %465 = vmatpush3.bf16.msra.mxu1 %v511_v12 }
  0x66   :  { %466 = vmatprep.subr.bf16.mxu1 %v647_v0  ;;  %481 = vmatpush3.bf16.msra.mxu0 %v517_v18 }
  0x67   :  { %482 = vmatprep.subr.bf16.mxu0 %v647_v0 }
  0x69   :  { %467 = vmatpush3.bf16.msra.mxu1 %v512_v13 }
  0x6a   :  { %483 = vmatpush3.bf16.msra.mxu0 %v518_v19 }
  0x6b   :  { %484 = vmatprep.subr.bf16.mxu0 %v647_v0 }
  0x6e   :  { %485 = vmatpush3.bf16.msra.mxu0 %v519_v28 }
  0x6f   :  { %486 = vmatprep.subr.bf16.mxu0 %v647_v0 }
  0x72   :  { %487 = vmatpush3.bf16.msra.mxu0 %v520_v29 }
 0x127   :  { %v147_v21 = vpop.f32.mrb[0].mxu0 }
 0x128   :  { %v450_v22 = vpop.f32.mrb[1].mxu0  ;;  %v148_v24 = vadd.f32 %v401_v20, %v147_v21 }
 0x129   :  { %v150_v23 = vpop.f32.mrb[2].mxu0 }
 0x12a   :  { %v151_v25 = vadd.f32 %v401_v20, %v150_v23  ;;  %v451_v26 = vpop.f32.mrb[3].mxu0 }
 0x12c   :  { %v154_v27 = vpack.c.bf16 %v151_v25, %v148_v24 }
 0x12e   :  { %469 = vmatmul.mubr.bf16.vlgmr.msra.gmra.mrb[0].mxu1 %v154_v27 }
 0x201   :  { %v260_v31 = vpop.f32.mrb[0].mxu1 }
 0x202   :  { %v470_v32 = vpop.f32.mrb[1].mxu1  ;;  %v261_v34 = vadd.f32 %v405_v30, %v260_v31 }
 0x203   :  { %v263_v33 = vpop.f32.mrb[2].mxu1 }
 0x204   :  { %v264_v35 = vadd.f32 %v405_v30, %v263_v33  ;;  %v471_v36 = vpop.f32.mrb[3].mxu1 }
 0x206   :  { %v267_v37 = vpack.c.bf16 %v264_v35, %v261_v34 }
 0x208   :  { %489 = vmatmul.mubr.bf16.vlgmr.msra.gmra.mrb[4].mxu0 %v267_v37 }
 0x2db   :  { %v373_v39 = vpop.f32.mrb[4].mxu0 }
 0x2dc   :  { %v374_v40 = vadd.f32 %v414_v38, %v373_v39  ;;  %v490_v41 = vpop.f32.mrb[5].mxu0 }
 0x2dd   :  { %v376_v42 = vpop.f32.mrb[6].mxu0 }
 0x2de   :  { %380 = vst [vmem:[#allocation10] sm:$0xff] %v374_v40  ;;  %v377_v43 = vadd.f32 %v414_v38, %v376_v42  ;;  %v491_v44 = vpop.f32.mrb[7].mxu0 }
 0x2e0   :  { %381 = vst [vmem:[#allocation10 + $0x8] sm:$0xff] %v377_v43 }
 0x2e1   :  { %620 = shalt.err (!%p617_p8)
}
 0x2e2   :  { %s621_s14 = scalar_lea.hbm %s812_s7, 256 }
 0x2e3   :  { %p622_p9 = scmp.ne.s32.totalorder %s812_s7, %s621_s14  ;;  %p625_p10 = scmp.lt.u32.totalorder %s621_s14, %s812_s7 }
 0x2e5   :  { %p627_p11 = pnand %p625_p10, %p622_p9 }
 0x2e7   :  { %630 = shalt.err (!%p627_p11)
}
 0x2e8   :  { %393 = dma.vmem_to_hbm [thread:$0]  %s388_s10, 256, %s812_s7, [#allocation4], %s643_s1, %s643_s1, %s644_s25  }
 0x2e9   :  { %637 = dma.done.wait [#allocation4], 256  }
 0x2ea   :  { %638 = vsyncadd [#allocation4], 4294967040 }
 0x2eb   :  { %397 = vsyncpa [#allocation3], 1 }
 0x2ec   :  { %398 = vsyncpa [#allocation6], 1 }
 0x2ed   :  { %399 = vsyncpa [#allocation9], 1 }
 0x2ee   :  { %400 = vsyncpa [#allocation4], 1 }

// kernel: tpu_custom_call.1
= control target key start
LH: loop header
LB: loop body
LE: loop exit
PB: predicated region body
PF: predicated region fallthrough
CT: control target
= control target key end

     0   :  { %12 = vsyncpa [#allocation3], 0  ;;  %s805_s0 = inlined_call_operand.hbm [shape: f32[16,32], index: 0, kind: input, shape index: {}]   ;;  %s806_s1 = inlined_call_operand.hbm [shape: bf16[32,128], index: 1, kind: input, shape index: {}]   ;;  %s807_s2 = inlined_call_operand.vmem [shape: f32[1,128], index: 2, kind: input, shape index: {}]   ;;  %s808_s3 = inlined_call_operand.hbm [shape: bf16[128,128], index: 3, kind: input, shape index: {}]   ;;  %s809_s4 = inlined_call_operand.vmem [shape: f32[1,128], index: 4, kind: input, shape index: {}]   ;;  %s810_s5 = inlined_call_operand.hbm [shape: bf16[128,128], index: 5, kind: input, shape index: {}]   ;;  %s811_s6 = inlined_call_operand.vmem [shape: f32[1,128], index: 6, kind: input, shape index: {}]   ;;  %s812_s7 = inlined_call_operand.hbm [shape: f32[16,128], index: 7, kind: output, shape index: {}]  }
   0x1   :  { %13 = vsyncpa [#allocation6], 0 }
   0x2   :  { %14 = vsyncpa [#allocation9], 0 }
   0x3   :  { %15 = vsyncpa [#allocation4], 0  ;;  %s639_s24 = smov [#allocation5]   ;;  %s521_s28 = scalar_lea.hbm %s806_s1, 256 }
   0x4   :  { %s33_s25 = sshll.u32 %s639_s24, 4  ;;  %p522_p0 = scmp.ne.s32.totalorder %s806_s1, %s521_s28  ;;  %s34_s25 = int_to_ptr.vmem [resolvable:$true] %s33_s25 }
   0x5   :  { %p525_p1 = scmp.lt.u32.totalorder %s521_s28, %s806_s1 }
   0x7   :  { %p527_p2 = pnand %p525_p1, %p522_p0 }
   0x9   :  { %530 = shalt.err (!%p527_p2)
}
   0xa   :  { %s531_s10 = scalar_lea.vmem %s34_s25, 256  ;;  %p536_p4 = scmp.lt.s32.totalorder %s34_s25, %s34_s25 }
   0xb   :  { %p532_p3 = scmp.ne.s32.totalorder %s34_s25, %s531_s10  ;;  %p537_p5 = scmp.lt.s32.totalorder %s531_s10, %s531_s10 }
   0xd   :  { %p538_p6 = por %p537_p5, %p536_p4 }
   0xf   :  { %p539_p7 = pnand %p538_p6, %p532_p3 }
  0x11   :  { %542 = shalt.err (!%p539_p7)
}
  0x12   :  { %s640_s11 = smov 64   ;;  %s641_s12 = smov 4  }
  0x13   :  { %39 = dma.hbm_to_vmem [thread:$0]  %s806_s1, 256, %s34_s25, [#allocation6], %s640_s11, %s640_s11, %s641_s12  }
  0x14   :  { %s642_s15 = smov [#allocation2]   ;;  %s543_s19 = scalar_lea.hbm %s805_s0, 256 }
  0x15   :  { %s21_s16 = sshll.u32 %s642_s15, 4  ;;  %p544_p8 = scmp.ne.s32.totalorder %s805_s0, %s543_s19  ;;  %s22_s16 = int_to_ptr.vmem [resolvable:$true] %s21_s16 }
  0x16   :  { %p547_p9 = scmp.lt.u32.totalorder %s543_s19, %s805_s0 }
  0x18   :  { %p549_p10 = pnand %p547_p9, %p544_p8 }
  0x1a   :  { %552 = shalt.err (!%p549_p10)
}
  0x1b   :  { %s553_s24 = scalar_lea.vmem %s22_s16, 256  ;;  %p558_p12 = scmp.lt.s32.totalorder %s22_s16, %s22_s16 }
  0x1c   :  { %p554_p11 = scmp.ne.s32.totalorder %s22_s16, %s553_s24  ;;  %p559_p13 = scmp.lt.s32.totalorder %s553_s24, %s553_s24 }
  0x1e   :  { %p560_p0 = por %p559_p13, %p558_p12 }
  0x20   :  { %p561_p1 = pnand %p560_p0, %p554_p11 }
  0x22   :  { %564 = shalt.err (!%p561_p1)
}
  0x23   :  { %s643_s1 = smov 128   ;;  %s644_s25 = smov 8  }
  0x24   :  { %27 = dma.hbm_to_vmem [thread:$0]  %s805_s0, 256, %s22_s16, [#allocation3], %s643_s1, %s643_s1, %s644_s25  }
  0x25   :  { %s645_s28 = smov [#allocation7]   ;;  %s646_s30 = smov [#allocation8]  }
  0x26   :  { %s47_s29 = sshll.u32 %s645_s28, 4  ;;  %s61_s8 = sshll.u32 %s646_s30, 4  ;;  %s48_s29 = int_to_ptr.vmem [resolvable:$true] %s47_s29  ;;  %s720_s8 = int_to_ptr.vmem [resolvable:$true] %s61_s8 }
  0x27   :  { %s565_s13 = scalar_lea.hbm %s808_s3, 1024 }
  0x28   :  { %p566_p2 = scmp.ne.s32.totalorder %s808_s3, %s565_s13  ;;  %p569_p3 = scmp.lt.u32.totalorder %s565_s13, %s808_s3 }
  0x2a   :  { %p571_p4 = pnand %p569_p3, %p566_p2 }
  0x2c   :  { %574 = shalt.err (!%p571_p4)
}
  0x2d   :  { %s575_s0 = scalar_lea.vmem %s48_s29, 1024  ;;  %p580_p6 = scmp.lt.s32.totalorder %s48_s29, %s48_s29 }
  0x2e   :  { %p576_p5 = scmp.ne.s32.totalorder %s48_s29, %s575_s0  ;;  %p581_p7 = scmp.lt.s32.totalorder %s575_s0, %s575_s0 }
  0x30   :  { %p582_p8 = por %p581_p7, %p580_p6 }
  0x32   :  { %p583_p9 = pnand %p582_p8, %p576_p5 }
  0x34   :  { %586 = shalt.err (!%p583_p9)
}
  0x35   :  { %53 = dma.hbm_to_vmem [thread:$0]  %s808_s3, 1024, %s48_s29, [#allocation6], %s640_s11, %s640_s11, %s641_s12  }
  0x36   :  { %s587_s22 = scalar_lea.hbm %s810_s5, 1024 }
  0x37   :  { %p588_p10 = scmp.ne.s32.totalorder %s810_s5, %s587_s22  ;;  %p591_p11 = scmp.lt.u32.totalorder %s587_s22, %s810_s5 }
  0x39   :  { %p593_p12 = pnand %p591_p11, %p588_p10 }
  0x3b   :  { %596 = shalt.err (!%p593_p12)
}
  0x3c   :  { %s597_s28 = scalar_lea.vmem %s720_s8, 1024  ;;  %p602_p0 = scmp.lt.s32.totalorder %s720_s8, %s720_s8 }
  0x3d   :  { %p598_p13 = scmp.ne.s32.totalorder %s720_s8, %s597_s28  ;;  %p603_p1 = scmp.lt.s32.totalorder %s597_s28, %s597_s28 }
  0x3f   :  { %p604_p2 = por %p603_p1, %p602_p0 }
  0x41   :  { %p605_p3 = pnand %p604_p2, %p598_p13 }
  0x43   :  { %608 = shalt.err (!%p605_p3)
}
  0x44   :  { %67 = dma.hbm_to_vmem [thread:$0]  %s810_s5, 1024, %s720_s8, [#allocation9], %s640_s11, %s640_s11, %s641_s12  }
  0x45   :  { %631 = dma.done.wait [#allocation3], 256  }
  0x46   :  { %632 = vsyncadd [#allocation3], 4294967040 }
  0x47   :  { %633 = dma.done.wait [#allocation6], 1280  }
  0x48   :  { %634 = vsyncadd [#allocation6], 4294966016 }
  0x49   :  { %635 = dma.done.wait [#allocation9], 1024  }
  0x4a   :  { %636 = vsyncadd [#allocation9], 4294966272  ;;  %v647_v0 = vmov 0.0   ;;  %vm648_vm0 = vmmov 0   ;;  %v503_v1 = vld [vmem:[#allocation5] sm:$0xff]   ;;  %v504_v2 = vld [vmem:[#allocation5 + $0x8] sm:$0xff]  }
  0x4b   :  { %444 = vmatprep.subr.bf16.mxu0 %v647_v0  ;;  %448 = vmatprep.mubr.msk.bf16.mxu0 %vm648_vm0, %v647_v0  ;;  %v83_v3 = vld [vmem:[#allocation2] sm:$0xff]  ;;  %v84_v4 = vld [vmem:[#allocation2 + $0x8] sm:$0xff]  ;;  %vm109_vm1 = vcmask 261120   ;;  %v507_v8 = vld [vmem:[#allocation7 + $0x10] sm:$0xff]   ;;  %s649_s9 = smov [#allocation10]  }
  0x4c   :  { %452 = vmatprep.subr.bf16.mxu1 %v647_v0  ;;  %468 = vmatprep.mubr.msk.bf16.mxu1 %vm648_vm0, %v647_v0  ;;  %v505_v5 = vld [vmem:[#allocation7] sm:$0xff]   ;;  %v85_v6 = vpack.c.bf16 %v84_v4, %v83_v3  ;;  %v506_v7 = vld [vmem:[#allocation7 + $0x8] sm:$0xff]   ;;  %v508_v9 = vld [vmem:[#allocation7 + $0x18] sm:$0xff]   ;;  %s387_s10 = sshll.u32 %s649_s9, 4  ;;  %s388_s10 = int_to_ptr.vmem [resolvable:$true] %s387_s10 }
  0x4d   :  { %445 = vmatpush3.bf16.msra.mxu0 %v503_v1  ;;  %453 = vmatpush3.bf16.msra.mxu1 %v505_v5  ;;  %v509_v10 = vld [vmem:[#allocation7 + $0x20] sm:$0xff]   ;;  %v510_v11 = vld [vmem:[#allocation7 + $0x28] sm:$0xff]   ;;  %v511_v12 = vld [vmem:[#allocation7 + $0x30] sm:$0xff]   ;;  %p614_p5 = scmp.lt.s32.totalorder %s388_s10, %s388_s10 }
  0x4e   :  { %446 = vmatprep.subr.bf16.mxu0 %v647_v0  ;;  %454 = vmatprep.subr.bf16.mxu1 %v647_v0  ;;  %v512_v13 = vld [vmem:[#allocation7 + $0x38] sm:$0xff]   ;;  %v513_v14 = vld [vmem:[#allocation8] sm:$0xff]   ;;  %v514_v15 = vld [vmem:[#allocation8 + $0x8] sm:$0xff]  }
  0x4f   :  { %v515_v16 = vld [vmem:[#allocation8 + $0x10] sm:$0xff]   ;;  %v516_v17 = vld [vmem:[#allocation8 + $0x18] sm:$0xff]   ;;  %v517_v18 = vld [vmem:[#allocation8 + $0x20] sm:$0xff]  }
  0x50   :  { %v518_v19 = vld [vmem:[#allocation8 + $0x28] sm:$0xff]   ;;  %v401_v20 = vld [vmem:[%s807_s2] ss:$0 sm:$0xff]  ;;  %v519_v28 = vld [vmem:[#allocation8 + $0x30] sm:$0xff]  }
  0x51   :  { %447 = vmatpush3.bf16.msra.mxu0 %v504_v2  ;;  %455 = vmatpush3.bf16.msra.mxu1 %v506_v7  ;;  %v520_v29 = vld [vmem:[#allocation8 + $0x38] sm:$0xff]   ;;  %v405_v30 = vld [vmem:[%s809_s4] ss:$0 sm:$0xff]  ;;  %s609_s4 = scalar_lea.vmem %s388_s10, 256 }
  0x52   :  { %472 = vmatprep.subr.bf16.mxu0 %v647_v0  ;;  %456 = vmatprep.subr.bf16.mxu1 %v647_v0  ;;  %v414_v38 = vld [vmem:[%s811_s6] ss:$0 sm:$0xff]  ;;  %p610_p4 = scmp.ne.s32.totalorder %s388_s10, %s609_s4  ;;  %p615_p6 = scmp.lt.s32.totalorder %s609_s4, %s609_s4 }
  0x54   :  { %449 = vmatmul.mubr.msk.bf16.vlgmr.msra.gmra.mrb[0].mxu0 %vm109_vm1, %v85_v6  ;;  %p616_p7 = por %p615_p6, %p614_p5 }
  0x55   :  { %488 = vmatprep.mubr.msk.bf16.mxu0 %vm648_vm0, %v647_v0  ;;  %457 = vmatpush3.bf16.msra.mxu1 %v507_v8 }
  0x56   :  { %458 = vmatprep.subr.bf16.mxu1 %v647_v0  ;;  %473 = vmatpush3.bf16.msra.mxu0 %v513_v14  ;;  %p617_p8 = pnand %p616_p7, %p610_p4 }
  0x57   :  { %474 = vmatprep.subr.bf16.mxu0 %v647_v0 }
  0x59   :  { %459 = vmatpush3.bf16.msra.mxu1 %v508_v9 }
  0x5a   :  { %460 = vmatprep.subr.bf16.mxu1 %v647_v0  ;;  %475 = vmatpush3.bf16.msra.mxu0 %v514_v15 }
  0x5b   :  { %476 = vmatprep.subr.bf16.mxu0 %v647_v0 }
  0x5d   :  { %461 = vmatpush3.bf16.msra.mxu1 %v509_v10 }
  0x5e   :  { %462 = vmatprep.subr.bf16.mxu1 %v647_v0  ;;  %477 = vmatpush3.bf16.msra.mxu0 %v515_v16 }
  0x5f   :  { %478 = vmatprep.subr.bf16.mxu0 %v647_v0 }
  0x61   :  { %463 = vmatpush3.bf16.msra.mxu1 %v510_v11 }
  0x62   :  { %464 = vmatprep.subr.bf16.mxu1 %v647_v0  ;;  %479 = vmatpush3.bf16.msra.mxu0 %v516_v17 }
  0x63   :  { %480 = vmatprep.subr.bf16.mxu0 %v647_v0 }
  0x65   :  { %465 = vmatpush3.bf16.msra.mxu1 %v511_v12 }
  0x66   :  { %466 = vmatprep.subr.bf16.mxu1 %v647_v0  ;;  %481 = vmatpush3.bf16.msra.mxu0 %v517_v18 }
  0x67   :  { %482 = vmatprep.subr.bf16.mxu0 %v647_v0 }
  0x69   :  { %467 = vmatpush3.bf16.msra.mxu1 %v512_v13 }
  0x6a   :  { %483 = vmatpush3.bf16.msra.mxu0 %v518_v19 }
  0x6b   :  { %484 = vmatprep.subr.bf16.mxu0 %v647_v0 }
  0x6e   :  { %485 = vmatpush3.bf16.msra.mxu0 %v519_v28 }
  0x6f   :  { %486 = vmatprep.subr.bf16.mxu0 %v647_v0 }
  0x72   :  { %487 = vmatpush3.bf16.msra.mxu0 %v520_v29 }
 0x127   :  { %v147_v21 = vpop.f32.mrb[0].mxu0 }
 0x128   :  { %v450_v22 = vpop.f32.mrb[1].mxu0  ;;  %v148_v24 = vadd.f32 %v401_v20, %v147_v21 }
 0x129   :  { %v150_v23 = vpop.f32.mrb[2].mxu0 }
 0x12a   :  { %v151_v25 = vadd.f32 %v401_v20, %v150_v23  ;;  %v451_v26 = vpop.f32.mrb[3].mxu0 }
 0x12c   :  { %v154_v27 = vpack.c.bf16 %v151_v25, %v148_v24 }
 0x12e   :  { %469 = vmatmul.mubr.bf16.vlgmr.msra.gmra.mrb[0].mxu1 %v154_v27 }
 0x201   :  { %v260_v31 = vpop.f32.mrb[0].mxu1 }
 0x202   :  { %v470_v32 = vpop.f32.mrb[1].mxu1  ;;  %v261_v34 = vadd.f32 %v405_v30, %v260_v31 }
 0x203   :  { %v263_v33 = vpop.f32.mrb[2].mxu1 }
 0x204   :  { %v264_v35 = vadd.f32 %v405_v30, %v263_v33  ;;  %v471_v36 = vpop.f32.mrb[3].mxu1 }
 0x206   :  { %v267_v37 = vpack.c.bf16 %v264_v35, %v261_v34 }
 0x208   :  { %489 = vmatmul.mubr.bf16.vlgmr.msra.gmra.mrb[4].mxu0 %v267_v37 }
 0x2db   :  { %v373_v39 = vpop.f32.mrb[4].mxu0 }
 0x2dc   :  { %v374_v40 = vadd.f32 %v414_v38, %v373_v39  ;;  %v490_v41 = vpop.f32.mrb[5].mxu0 }
 0x2dd   :  { %v376_v42 = vpop.f32.mrb[6].mxu0 }
 0x2de   :  { %380 = vst [vmem:[#allocation10] sm:$0xff] %v374_v40  ;;  %v377_v43 = vadd.f32 %v414_v38, %v376_v42  ;;  %v491_v44 = vpop.f32.mrb[7].mxu0 }
 0x2e0   :  { %381 = vst [vmem:[#allocation10 + $0x8] sm:$0xff] %v377_v43 }
 0x2e1   :  { %620 = shalt.err (!%p617_p8)
}
 0x2e2   :  { %s621_s14 = scalar_lea.hbm %s812_s7, 256 }
 0x2e3   :  { %p622_p9 = scmp.ne.s32.totalorder %s812_s7, %s621_s14  ;;  %p625_p10 = scmp.lt.u32.totalorder %s621_s14, %s812_s7 }
 0x2e5   :  { %p627_p11 = pnand %p625_p10, %p622_p9 }
 0x2e7   :  { %630 = shalt.err (!%p627_p11)
}
 0x2e8   :  { %393 = dma.vmem_to_hbm [thread:$0]  %s388_s10, 256, %s812_s7, [#allocation4], %s643_s1, %s643_s1, %s644_s25  }
 0x2e9   :  { %637 = dma.done.wait [#allocation4], 256  }
 0x2ea   :  { %638 = vsyncadd [#allocation4], 4294967040 }
 0x2eb   :  { %397 = vsyncpa [#allocation3], 1 }
 0x2ec   :  { %398 = vsyncpa [#allocation6], 1 }
 0x2ed   :  { %399 = vsyncpa [#allocation9], 1 }
 0x2ee   :  { %400 = vsyncpa [#allocation4], 1 }

</bundles_post_ra>
